<compile_context>
chip_gen: v7x
topology: tpu7x:2x2x1
jax: 0.10.0
libtpu: 0.0.40
codegen_flags: <defaults>
</compile_context>

<pallas_src>
import jax
import jax.numpy as jnp
from jax import lax
from jax.experimental import pallas as pl
from jax.experimental.pallas import tpu as pltpu


HF = 128          # lane width of the working hidden state: [h | 1.0 | zeros]
_SUBLANE = 8      # f32 sublane group
_FORCE = 100.0    # sigmoid(100) == 1.0 exactly in f32 -> preserves the ones-lane
_UNROLL_MAX = 32  # full Python unroll up to this T, fori_loop(unroll=8) beyond


def _round_up(x, m):
    return ((x + m - 1) // m) * m


# ----------------------------------------------------------------------------
# Kernel
# ----------------------------------------------------------------------------
def _gru_decoder_kernel(tok_ref, h0_ref, w_in_ref, w_hh_ref, w_out_ref,
                        logits_ref, h_final_ref, gi_ref, hs_ref):
    """Single-program GRU decoder over the whole (small) sequence.

    tok_ref    : (T*B_pad, 1)      i32   flattened character ids
    h0_ref     : (B_pad, 128)      f32   [h0 | 1.0 | zeros]
    w_in_ref   : (C_pad, 256)      bf16  emb@[W_in|W_iz|W_ir] fused, bias row at C_pad-1
    w_hh_ref   : (128, 256)        bf16  [W_hn|W_hz|W_hr] fused, b_hn row at H
    w_out_ref  : (128, C_pad)      bf16  W_out with b_out row at H
    logits_ref : (T*B_pad, C_pad)  f32   per-step logits (lane-dense)
    h_final_ref: (B_pad, 128)      f32   final hidden state (lanes 0:H valid)
    gi_ref     : (T*B_pad, 256)    f32   scratch: hoisted input-path gates
    hs_ref     : (T*B_pad, 128)    bf16  scratch: per-step hidden history
    """
    B_pad, hw = h0_ref.shape               # hw == 128
    TB = tok_ref.shape[0]
    T = TB // B_pad
    C_pad = w_in_ref.shape[0]
    half = hw // 2                          # 64: direction-independent roll amount

    # ---- Hoisted input path: ONE bf16 MXU matmul for emb + all three
    # input->gate projections + every unconditional bias (bias "one" at column
    # C_pad-1 of the one-hot selects the bias row of w_in).
    tok = tok_ref[...]                                              # (TB, 1) i32
    col = lax.broadcasted_iota(jnp.int32, (TB, C_pad), 1)
    onehot = jnp.logical_or(col == tok, col == C_pad - 1)
    onehot = onehot.astype(jnp.float32).astype(jnp.bfloat16)
    gi_ref[...] = jnp.dot(onehot, w_in_ref[...],
                          preferred_element_type=jnp.float32)       # (TB, 256) f32

    h = h0_ref[...]                                                 # (B_pad, 128) f32
    hb = h.astype(jnp.bfloat16)

    def step(row0, h, hb):
        gi = gi_ref[pl.ds(row0, B_pad), :]                          # (B_pad, 256) f32
        # The ONLY MXU push on the serial chain: fused hidden matmul.  The
        # ones-lane of h (lane H) pulls in b_hn from row H of w_hh.
        gh = jnp.dot(hb, w_hh_ref[...],
                     preferred_element_type=jnp.float32)            # (B_pad, 256) f32
        gi_n, gi_zr = gi[:, :hw], gi[:, hw:]                        # vreg-aligned slices
        gh_n, gh_zr = gh[:, :hw], gh[:, hw:]
        # Gate vreg layout: z in lanes 0:H (aligned with h), force-to-1 column
        # at lane H (keeps the ones-lane exact), r in lanes 64:64+H.
        zr = jax.nn.sigmoid(gi_zr + gh_zr)                          # full-width EUP
        r_al = pltpu.roll(zr, half, axis=1)                         # r -> lanes 0:H (half rotation)
        n = jnp.tanh(gi_n + r_al * gh_n)                            # gh_n already holds b_hn
        h_new = (1.0 - zr) * n + zr * h                             # GRU blend, f32
        hb_new = h_new.astype(jnp.bfloat16)
        hs_ref[pl.ds(row0, B_pad), :] = hb_new                      # aligned lane-dense store
        return h_new, hb_new

    if T <= _UNROLL_MAX:
        # Small static T: straight-line code, scheduler sees across steps.
        for t in range(T):
            h, hb = step(t * B_pad, h, hb)
    else:
        # Large T: bound code size / vreg live ranges with a partial unroll.
        def body(t, carry):
            h_c, hb_c = carry
            return step(pl.multiple_of(t * B_pad, B_pad), h_c, hb_c)
        h, hb = lax.fori_loop(0, T, body, (h, hb), unroll=8)

    h_final_ref[...] = h

    # Deferred output projection: ONE bf16 MXU matmul over the whole history,
    # b_out rides the ones-lane (row H of w_out); single lane-dense f32 store.
    logits_ref[...] = jnp.dot(hs_ref[...], w_out_ref[...],
                              preferred_element_type=jnp.float32)


# ----------------------------------------------------------------------------
# Wrapper-side parameter fusion (done once) + jitted forward
# ----------------------------------------------------------------------------
def prepare_fused_params(params):
    """Fuse / pad / bf16-cast the PyTorch-layout parameters (gate order r,z,n)."""
    emb = jnp.asarray(params["emb"], jnp.float32)       # (C, E)
    w_ih = jnp.asarray(params["w_ih"], jnp.float32)     # (3, E, H)
    b_ih = jnp.asarray(params["b_ih"], jnp.float32)     # (3, 1, H)
    w_hh = jnp.asarray(params["w_hh"], jnp.float32)     # (3, H, H)
    b_hh = jnp.asarray(params["b_hh"], jnp.float32)     # (3, 1, H)
    w_out = jnp.asarray(params["w_out"], jnp.float32)   # (H, C)
    b_out = jnp.asarray(params["b_out"], jnp.float32)   # (1, C)

    C = emb.shape[0]
    H = w_hh.shape[-1]
    assert H < HF // 2, "gate layout assumes hidden_size < 64"
    C_pad = _round_up(C + 1, 128)                       # +1 for the bias row
    G = 2 * HF                                          # two 128-lane gate vregs
    Z_OFF = HF                                          # z gate: lanes 0:H of vreg1
    R_OFF = HF + HF // 2                                # r gate: lanes 64:64+H of vreg1
    bias_row = C_pad - 1

    # Input-side fused matrix: rows = one-hot index (tokens 0..C-1, bias row).
    w_inp = jnp.zeros((C_pad, G), jnp.float32)
    w_inp = w_inp.at[:C, 0:H].set(emb @ w_ih[2])                         # n
    w_inp = w_inp.at[:C, Z_OFF:Z_OFF + H].set(emb @ w_ih[1])             # z
    w_inp = w_inp.at[:C, R_OFF:R_OFF + H].set(emb @ w_ih[0])             # r
    w_inp = w_inp.at[bias_row, 0:H].set(b_ih[2, 0])                      # b_in
    w_inp = w_inp.at[bias_row, Z_OFF:Z_OFF + H].set(b_ih[1, 0] + b_hh[1, 0])
    w_inp = w_inp.at[bias_row, R_OFF:R_OFF + H].set(b_ih[0, 0] + b_hh[0, 0])
    w_inp = w_inp.at[bias_row, Z_OFF + H].set(_FORCE)    # forces z==1 at the ones-lane

    # Hidden-side fused matrix: rows = h_full lanes (h in 0:H, 1.0 at lane H).
    w_hh_f = jnp.zeros((HF, G), jnp.float32)
    w_hh_f = w_hh_f.at[:H, 0:H].set(w_hh[2])                             # W_hn
    w_hh_f = w_hh_f.at[:H, Z_OFF:Z_OFF + H].set(w_hh[1])                 # W_hz
    w_hh_f = w_hh_f.at[:H, R_OFF:R_OFF + H].set(w_hh[0])                 # W_hr
    w_hh_f = w_hh_f.at[H, 0:H].set(b_hh[2, 0])                           # b_hn (inside r*(.))

    # Output projection with b_out folded via the ones-lane (row H).
    w_out_f = jnp.zeros((HF, C_pad), jnp.float32)
    w_out_f = w_out_f.at[:H, :C].set(w_out)
    w_out_f = w_out_f.at[H, :C].set(b_out[0])

    fused = {
        "w_inp": w_inp.astype(jnp.bfloat16),
        "w_hh": w_hh_f.astype(jnp.bfloat16),
        "w_out": w_out_f.astype(jnp.bfloat16),
    }
    return fused, (C, H, C_pad)


def make_char_decoder(params):
    """Fuses parameters ONCE (off the per-call path) and returns a jitted
    forward(hidden, tokens) -> (logits (T,B,C), h_final (1,B,H))."""
    fused, (C, H, C_pad) = prepare_fused_params(params)
    w_inp, w_hh_f, w_out_f = fused["w_inp"], fused["w_hh"], fused["w_out"]

    # TODO(synk): torch packs `packed_input` as a PackedSequence (ragged batch);
    # this implementation takes dense time-major (T, B) token ids instead.
    @jax.jit
    def forward(hidden, tokens):
        T, B = tokens.shape
        B_pad = _round_up(max(B, 1), _SUBLANE)           # sublane-aligned batch

        tok = jnp.zeros((T, B_pad), jnp.int32).at[:, :B].set(tokens.astype(jnp.int32))
        tok = tok.reshape(T * B_pad, 1)

        h0 = jnp.zeros((B_pad, HF), jnp.float32)
        h0 = h0.at[:B, :H].set(hidden[0].astype(jnp.float32))
        h0 = h0.at[:, H].set(1.0)                        # ones-lane drives b_hn / b_out

        vmem = pl.BlockSpec(memory_space=pltpu.MemorySpace.VMEM)
        logits_p, h_fin = pl.pallas_call(
            _gru_decoder_kernel,
            out_shape=(jax.ShapeDtypeStruct((T * B_pad, C_pad), jnp.float32),
                       jax.ShapeDtypeStruct((B_pad, HF), jnp.float32)),
            in_specs=[vmem] * 5,
            out_specs=(vmem, vmem),
            scratch_shapes=[pltpu.VMEM((T * B_pad, 2 * HF), jnp.float32),   # gi_all
                            pltpu.VMEM((T * B_pad, HF), jnp.bfloat16)],     # h history
        )(tok, h0, w_inp, w_hh_f, w_out_f)

        logits = logits_p.reshape(T, B_pad, C_pad)[:, :B, :C]
        return logits, h_fin[:B, :H][None]               # (T,B,C), (1,B,H)

    return forward


# ----------------------------------------------------------------------------
# Parameters & references
# ----------------------------------------------------------------------------
def init_params(key, char_count=28, char_embedding_size=32, hidden_size=32):
    """Deterministic synthetic parameters (shapes match the PyTorch module)."""
    C, E, H = char_count, char_embedding_size, hidden_size
    ks = jax.random.split(key, 7)
    s = 1.0 / jnp.sqrt(H).astype(jnp.float32)
    u = lambda k, shape: jax.random.uniform(k, shape, jnp.float32, -s, s)
    return {
        "emb": jax.random.normal(ks[0], (C, E), jnp.float32),    # nn.Embedding
        "w_ih": u(ks[1], (3, E, H)),                             # GRU W_ih (r,z,n)
        "b_ih": u(ks[2], (3, 1, H)),
        "w_hh": u(ks[3], (3, H, H)),                             # GRU W_hh (r,z,n)
        "b_hh": u(ks[4], (3, 1, H)),
        "w_out": u(ks[5], (H, C)),                               # nn.Linear weight^T
        "b_out": u(ks[6], (1, C)),                               # nn.Linear bias
    }


def reference_forward(params, hidden, tokens):
    """Independent textbook f32 GRU decoder (PyTorch gate order r,z,n)."""
    C = params["emb"].shape[0]
    onehot = jax.nn.one_hot(tokens, C, dtype=jnp.float32)
    h = hidden[0]

    def step(h, x_oh):
        x = x_oh @ params["emb"]
        gi = jnp.einsum("be,geh->gbh", x, params["w_ih"]) + params["b_ih"]
        gh = jnp.einsum("bh,ghk->gbk", h, params["w_hh"]) + params["b_hh"]
        r = jax.nn.sigmoid(gi[0] + gh[0])
        z = jax.nn.sigmoid(gi[1] + gh[1])
        n = jnp.tanh(gi[2] + r * gh[2])
        h_new = (1.0 - z) * n + z * h
        return h_new, h_new @ params["w_out"] + params["b_out"]

    h_final, logits = lax.scan(step, h, onehot)
    return logits, h_final[None]


def reference_forward_bf16(params, hidden, tokens):
    """Same math with the kernel's numerics emulated (bf16 weights / bf16 h at
    every matmul boundary, f32 accumulation & elementwise)."""
    f32 = jnp.float32
    bf = lambda x: x.astype(jnp.bfloat16)
    bff = lambda x: bf(x).astype(f32)

    emb, w_ih, b_ih = params["emb"], params["w_ih"], params["b_ih"]
    w_hh, b_hh = params["w_hh"], params["b_hh"]
    w_out, b_out = params["w_out"], params["b_out"]

    Wi = [bf(emb @ w_ih[g]) for g in range(3)]          # emb folded, bf16 rounded
    Wh = [bf(w_hh[g]) for g in range(3)]
    b_r = bff(b_ih[0, 0] + b_hh[0, 0])
    b_z = bff(b_ih[1, 0] + b_hh[1, 0])
    b_n = bff(b_ih[2, 0])
    b_hn = bff(b_hh[2, 0])
    Wo, b_o = bf(w_out), bff(b_out[0])

    h = hidden[0].astype(f32)
    T, _ = tokens.shape
    logits = []
    for t in range(T):
        tok = tokens[t]
        hb = bf(h)
        gi = [Wi[g][tok].astype(f32) for g in range(3)]
        gh = [jnp.dot(hb, Wh[g], preferred_element_type=f32) for g in range(3)]
        r = jax.nn.sigmoid(gi[0] + b_r + gh[0])
        z = jax.nn.sigmoid(gi[1] + b_z + gh[1])
        n = jnp.tanh(gi[2] + b_n + r * (gh[2] + b_hn))
        h = (1.0 - z) * n + z * h
        logits.append(jnp.dot(bf(h), Wo, preferred_element_type=f32) + b_o)
    return jnp.stack(logits, axis=0), h[None]


# ----------------------------------------------------------------------------
if __name__ == "__main__":
    key = jax.random.PRNGKey(0)
    k_par, k_tok, k_hid = jax.random.split(key, 3)

    T, B = 8, 2
    char_count, hidden_size, char_embedding_size = 28, 32, 32

    params = init_params(k_par, char_count, char_embedding_size, hidden_size)
    tokens = jax.random.randint(k_tok, (T, B), 0, char_count, dtype=jnp.int32)
    hidden = jax.random.normal(k_hid, (1, B, hidden_size), jnp.float32)

    forward = make_char_decoder(params)      # parameter fusion happens once here
    logits, h_final = forward(hidden, tokens)
    jax.block_until_ready((logits, h_final))

    # 1) Numerics-matched reference (bf16 weights / bf16 h at matmul boundaries):
    #    validates the fusion / bias folding / gate layout tightly.
    ref_l, ref_h = reference_forward_bf16(params, hidden, tokens)
    assert jnp.allclose(logits, ref_l, atol=5e-3, rtol=5e-3), \
        float(jnp.max(jnp.abs(logits - ref_l)))
    assert jnp.allclose(h_final, ref_h, atol=5e-3, rtol=5e-3), \
        float(jnp.max(jnp.abs(h_final - ref_h)))

    # 2) Independent full-precision reference: tolerance reflects bf16
    #    weights / hidden state on the MXU (per the performance review).
    ref_l32, ref_h32 = reference_forward(params, hidden, tokens)
    assert jnp.allclose(logits, ref_l32, atol=1e-1, rtol=1e-1)
    assert jnp.allclose(h_final, ref_h32, atol=1e-1, rtol=1e-1)

    print("KERNEL_OK")
</pallas_src>

<mosaic_0001>
module attributes {stable_mosaic.version = 11 : i64} {
  func.func @_gru_decoder_kernel(%arg0: memref<64x1xi32, #tpu.memory_space<vmem>>, %arg1: memref<8x128xf32, #tpu.memory_space<vmem>>, %arg2: memref<128x256xbf16, #tpu.memory_space<vmem>>, %arg3: memref<128x256xbf16, #tpu.memory_space<vmem>>, %arg4: memref<128x128xbf16, #tpu.memory_space<vmem>>, %arg5: memref<64x128xf32, #tpu.memory_space<vmem>>, %arg6: memref<8x128xf32, #tpu.memory_space<vmem>>, %arg7: memref<64x256xf32, #tpu.memory_space<vmem>>, %arg8: memref<64x128xbf16, #tpu.memory_space<vmem>>) attributes {dimension_semantics = [], scalar_prefetch = 0 : i64, scratch_operands = 2 : i64, tpu.core_type = #tpu.core_type<tc>} {
    %c0 = arith.constant 0 : index
    %c0_0 = arith.constant 0 : index
    %0 = vector.load %arg0[%c0, %c0_0] : memref<64x1xi32, #tpu.memory_space<vmem>>, vector<64x1xi32>
    %1 = tpu.iota {dimensions = array<i32: 1>} : vector<64x128xi32>
    %2 = vector.broadcast %0 : vector<64x1xi32> to vector<64x128xi32>
    %3 = arith.cmpi eq, %1, %2 : vector<64x128xi32>
    %c127_i32 = arith.constant 127 : i32
    %4 = vector.broadcast %c127_i32 : i32 to vector<64x128xi32>
    %5 = arith.cmpi eq, %1, %4 : vector<64x128xi32>
    %6 = arith.ori %3, %5 : vector<64x128xi1>
    %7 = arith.extui %6 : vector<64x128xi1> to vector<64x128xi32>
    %8 = arith.sitofp %7 : vector<64x128xi32> to vector<64x128xf32>
    %9 = arith.truncf %8 : vector<64x128xf32> to vector<64x128xbf16>
    %c0_1 = arith.constant 0 : index
    %c0_2 = arith.constant 0 : index
    %10 = vector.load %arg2[%c0_1, %c0_2] : memref<128x256xbf16, #tpu.memory_space<vmem>>, vector<128x256xbf16>
    %cst = arith.constant dense<0.000000e+00> : vector<64x256xf32>
    %11 = tpu.matmul %9, %10, %cst {dimension_numbers = #tpu.dot_dimension_numbers<[1], [0], [0], [1], [0, 0, 1, 1], [], []>} : vector<64x128xbf16>, vector<128x256xbf16>, vector<64x256xf32> -> vector<64x256xf32>
    %c0_3 = arith.constant 0 : index
    %c0_4 = arith.constant 0 : index
    %12 = vector.load %arg7[%c0_3, %c0_4] : memref<64x256xf32, #tpu.memory_space<vmem>>, vector<64x256xf32>
    tpu.vector_store %arg7[%c0_3, %c0_4], %11 {strides = array<i32>} : memref<64x256xf32, #tpu.memory_space<vmem>>, vector<64x256xf32>,
    %c0_5 = arith.constant 0 : index
    %c0_6 = arith.constant 0 : index
    %13 = vector.load %arg1[%c0_5, %c0_6] : memref<8x128xf32, #tpu.memory_space<vmem>>, vector<8x128xf32>
    %14 = arith.truncf %13 : vector<8x128xf32> to vector<8x128xbf16>
    %c0_7 = arith.constant 0 : index
    %c0_8 = arith.constant 0 : index
    %15 = vector.load %arg7[%c0_7, %c0_8] : memref<64x256xf32, #tpu.memory_space<vmem>>, vector<8x256xf32>
    %c0_9 = arith.constant 0 : index
    %c0_10 = arith.constant 0 : index
    %16 = vector.load %arg3[%c0_9, %c0_10] : memref<128x256xbf16, #tpu.memory_space<vmem>>, vector<128x256xbf16>
    %cst_11 = arith.constant dense<0.000000e+00> : vector<8x256xf32>
    %17 = tpu.matmul %14, %16, %cst_11 {dimension_numbers = #tpu.dot_dimension_numbers<[1], [0], [0], [1], [0, 0, 1, 1], [], []>} : vector<8x128xbf16>, vector<128x256xbf16>, vector<8x256xf32> -> vector<8x256xf32>
    %18 = vector.extract_strided_slice %15 {offsets = [0, 0], sizes = [8, 128], strides = [1, 1]} : vector<8x256xf32> to vector<8x128xf32>
    %19 = vector.extract_strided_slice %15 {offsets = [0, 128], sizes = [8, 128], strides = [1, 1]} : vector<8x256xf32> to vector<8x128xf32>
    %20 = vector.extract_strided_slice %17 {offsets = [0, 0], sizes = [8, 128], strides = [1, 1]} : vector<8x256xf32> to vector<8x128xf32>
    %21 = vector.extract_strided_slice %17 {offsets = [0, 128], sizes = [8, 128], strides = [1, 1]} : vector<8x256xf32> to vector<8x128xf32>
    %22 = arith.addf %19, %21 : vector<8x128xf32>
    %23 = arith.negf %22 : vector<8x128xf32>
    %24 = math.exp %23 : vector<8x128xf32>
    %cst_12 = arith.constant 1.000000e+00 : f32
    %25 = vector.broadcast %cst_12 : f32 to vector<8x128xf32>
    %26 = arith.addf %25, %24 : vector<8x128xf32>
    %27 = arith.divf %25, %26 : vector<8x128xf32>
    %c64_i32 = arith.constant 64 : i32
    %28 = tpu.dynamic_rotate %27 by %c64_i32 dim 1 : vector<8x128xf32>, i32 -> vector<8x128xf32>
    %29 = arith.mulf %28, %20 : vector<8x128xf32>
    %30 = arith.addf %18, %29 : vector<8x128xf32>
    %31 = math.tanh %30 : vector<8x128xf32>
    %cst_13 = arith.constant 1.000000e+00 : f32
    %32 = vector.broadcast %cst_13 : f32 to vector<8x128xf32>
    %33 = arith.subf %32, %27 : vector<8x128xf32>
    %34 = arith.mulf %33, %31 : vector<8x128xf32>
    %35 = arith.mulf %27, %13 : vector<8x128xf32>
    %36 = arith.addf %34, %35 : vector<8x128xf32>
    %37 = arith.truncf %36 : vector<8x128xf32> to vector<8x128xbf16>
    %c0_14 = arith.constant 0 : index
    %c0_15 = arith.constant 0 : index
    %38 = vector.load %arg8[%c0_14, %c0_15] : memref<64x128xbf16, #tpu.memory_space<vmem>>, vector<8x128xbf16>
    tpu.vector_store %arg8[%c0_14, %c0_15], %37 {strides = array<i32>} : memref<64x128xbf16, #tpu.memory_space<vmem>>, vector<8x128xbf16>,
    %c8 = arith.constant 8 : index
    %c0_16 = arith.constant 0 : index
    %39 = vector.load %arg7[%c8, %c0_16] : memref<64x256xf32, #tpu.memory_space<vmem>>, vector<8x256xf32>
    %c0_17 = arith.constant 0 : index
    %c0_18 = arith.constant 0 : index
    %40 = vector.load %arg3[%c0_17, %c0_18] : memref<128x256xbf16, #tpu.memory_space<vmem>>, vector<128x256xbf16>
    %cst_19 = arith.constant dense<0.000000e+00> : vector<8x256xf32>
    %41 = tpu.matmul %37, %40, %cst_19 {dimension_numbers = #tpu.dot_dimension_numbers<[1], [0], [0], [1], [0, 0, 1, 1], [], []>} : vector<8x128xbf16>, vector<128x256xbf16>, vector<8x256xf32> -> vector<8x256xf32>
    %42 = vector.extract_strided_slice %39 {offsets = [0, 0], sizes = [8, 128], strides = [1, 1]} : vector<8x256xf32> to vector<8x128xf32>
    %43 = vector.extract_strided_slice %39 {offsets = [0, 128], sizes = [8, 128], strides = [1, 1]} : vector<8x256xf32> to vector<8x128xf32>
    %44 = vector.extract_strided_slice %41 {offsets = [0, 0], sizes = [8, 128], strides = [1, 1]} : vector<8x256xf32> to vector<8x128xf32>
    %45 = vector.extract_strided_slice %41 {offsets = [0, 128], sizes = [8, 128], strides = [1, 1]} : vector<8x256xf32> to vector<8x128xf32>
    %46 = arith.addf %43, %45 : vector<8x128xf32>
    %47 = arith.negf %46 : vector<8x128xf32>
    %48 = math.exp %47 : vector<8x128xf32>
    %cst_20 = arith.constant 1.000000e+00 : f32
    %49 = vector.broadcast %cst_20 : f32 to vector<8x128xf32>
    %50 = arith.addf %49, %48 : vector<8x128xf32>
    %51 = arith.divf %49, %50 : vector<8x128xf32>
    %c64_i32_21 = arith.constant 64 : i32
    %52 = tpu.dynamic_rotate %51 by %c64_i32_21 dim 1 : vector<8x128xf32>, i32 -> vector<8x128xf32>
    %53 = arith.mulf %52, %44 : vector<8x128xf32>
    %54 = arith.addf %42, %53 : vector<8x128xf32>
    %55 = math.tanh %54 : vector<8x128xf32>
    %cst_22 = arith.constant 1.000000e+00 : f32
    %56 = vector.broadcast %cst_22 : f32 to vector<8x128xf32>
    %57 = arith.subf %56, %51 : vector<8x128xf32>
    %58 = arith.mulf %57, %55 : vector<8x128xf32>
    %59 = arith.mulf %51, %36 : vector<8x128xf32>
    %60 = arith.addf %58, %59 : vector<8x128xf32>
    %61 = arith.truncf %60 : vector<8x128xf32> to vector<8x128xbf16>
    %c8_23 = arith.constant 8 : index
    %c0_24 = arith.constant 0 : index
    %62 = vector.load %arg8[%c8_23, %c0_24] : memref<64x128xbf16, #tpu.memory_space<vmem>>, vector<8x128xbf16>
    tpu.vector_store %arg8[%c8_23, %c0_24], %61 {strides = array<i32>} : memref<64x128xbf16, #tpu.memory_space<vmem>>, vector<8x128xbf16>,
    %c16 = arith.constant 16 : index
    %c0_25 = arith.constant 0 : index
    %63 = vector.load %arg7[%c16, %c0_25] : memref<64x256xf32, #tpu.memory_space<vmem>>, vector<8x256xf32>
    %c0_26 = arith.constant 0 : index
    %c0_27 = arith.constant 0 : index
    %64 = vector.load %arg3[%c0_26, %c0_27] : memref<128x256xbf16, #tpu.memory_space<vmem>>, vector<128x256xbf16>
    %cst_28 = arith.constant dense<0.000000e+00> : vector<8x256xf32>
    %65 = tpu.matmul %61, %64, %cst_28 {dimension_numbers = #tpu.dot_dimension_numbers<[1], [0], [0], [1], [0, 0, 1, 1], [], []>} : vector<8x128xbf16>, vector<128x256xbf16>, vector<8x256xf32> -> vector<8x256xf32>
    %66 = vector.extract_strided_slice %63 {offsets = [0, 0], sizes = [8, 128], strides = [1, 1]} : vector<8x256xf32> to vector<8x128xf32>
    %67 = vector.extract_strided_slice %63 {offsets = [0, 128], sizes = [8, 128], strides = [1, 1]} : vector<8x256xf32> to vector<8x128xf32>
    %68 = vector.extract_strided_slice %65 {offsets = [0, 0], sizes = [8, 128], strides = [1, 1]} : vector<8x256xf32> to vector<8x128xf32>
    %69 = vector.extract_strided_slice %65 {offsets = [0, 128], sizes = [8, 128], strides = [1, 1]} : vector<8x256xf32> to vector<8x128xf32>
    %70 = arith.addf %67, %69 : vector<8x128xf32>
    %71 = arith.negf %70 : vector<8x128xf32>
    %72 = math.exp %71 : vector<8x128xf32>
    %cst_29 = arith.constant 1.000000e+00 : f32
    %73 = vector.broadcast %cst_29 : f32 to vector<8x128xf32>
    %74 = arith.addf %73, %72 : vector<8x128xf32>
    %75 = arith.divf %73, %74 : vector<8x128xf32>
    %c64_i32_30 = arith.constant 64 : i32
    %76 = tpu.dynamic_rotate %75 by %c64_i32_30 dim 1 : vector<8x128xf32>, i32 -> vector<8x128xf32>
    %77 = arith.mulf %76, %68 : vector<8x128xf32>
    %78 = arith.addf %66, %77 : vector<8x128xf32>
    %79 = math.tanh %78 : vector<8x128xf32>
    %cst_31 = arith.constant 1.000000e+00 : f32
    %80 = vector.broadcast %cst_31 : f32 to vector<8x128xf32>
    %81 = arith.subf %80, %75 : vector<8x128xf32>
    %82 = arith.mulf %81, %79 : vector<8x128xf32>
    %83 = arith.mulf %75, %60 : vector<8x128xf32>
    %84 = arith.addf %82, %83 : vector<8x128xf32>
    %85 = arith.truncf %84 : vector<8x128xf32> to vector<8x128xbf16>
    %c16_32 = arith.constant 16 : index
    %c0_33 = arith.constant 0 : index
    %86 = vector.load %arg8[%c16_32, %c0_33] : memref<64x128xbf16, #tpu.memory_space<vmem>>, vector<8x128xbf16>
    tpu.vector_store %arg8[%c16_32, %c0_33], %85 {strides = array<i32>} : memref<64x128xbf16, #tpu.memory_space<vmem>>, vector<8x128xbf16>,
    %c24 = arith.constant 24 : index
    %c0_34 = arith.constant 0 : index
    %87 = vector.load %arg7[%c24, %c0_34] : memref<64x256xf32, #tpu.memory_space<vmem>>, vector<8x256xf32>
    %c0_35 = arith.constant 0 : index
    %c0_36 = arith.constant 0 : index
    %88 = vector.load %arg3[%c0_35, %c0_36] : memref<128x256xbf16, #tpu.memory_space<vmem>>, vector<128x256xbf16>
    %cst_37 = arith.constant dense<0.000000e+00> : vector<8x256xf32>
    %89 = tpu.matmul %85, %88, %cst_37 {dimension_numbers = #tpu.dot_dimension_numbers<[1], [0], [0], [1], [0, 0, 1, 1], [], []>} : vector<8x128xbf16>, vector<128x256xbf16>, vector<8x256xf32> -> vector<8x256xf32>
    %90 = vector.extract_strided_slice %87 {offsets = [0, 0], sizes = [8, 128], strides = [1, 1]} : vector<8x256xf32> to vector<8x128xf32>
    %91 = vector.extract_strided_slice %87 {offsets = [0, 128], sizes = [8, 128], strides = [1, 1]} : vector<8x256xf32> to vector<8x128xf32>
    %92 = vector.extract_strided_slice %89 {offsets = [0, 0], sizes = [8, 128], strides = [1, 1]} : vector<8x256xf32> to vector<8x128xf32>
    %93 = vector.extract_strided_slice %89 {offsets = [0, 128], sizes = [8, 128], strides = [1, 1]} : vector<8x256xf32> to vector<8x128xf32>
    %94 = arith.addf %91, %93 : vector<8x128xf32>
    %95 = arith.negf %94 : vector<8x128xf32>
    %96 = math.exp %95 : vector<8x128xf32>
    %cst_38 = arith.constant 1.000000e+00 : f32
    %97 = vector.broadcast %cst_38 : f32 to vector<8x128xf32>
    %98 = arith.addf %97, %96 : vector<8x128xf32>
    %99 = arith.divf %97, %98 : vector<8x128xf32>
    %c64_i32_39 = arith.constant 64 : i32
    %100 = tpu.dynamic_rotate %99 by %c64_i32_39 dim 1 : vector<8x128xf32>, i32 -> vector<8x128xf32>
    %101 = arith.mulf %100, %92 : vector<8x128xf32>
    %102 = arith.addf %90, %101 : vector<8x128xf32>
    %103 = math.tanh %102 : vector<8x128xf32>
    %cst_40 = arith.constant 1.000000e+00 : f32
    %104 = vector.broadcast %cst_40 : f32 to vector<8x128xf32>
    %105 = arith.subf %104, %99 : vector<8x128xf32>
    %106 = arith.mulf %105, %103 : vector<8x128xf32>
    %107 = arith.mulf %99, %84 : vector<8x128xf32>
    %108 = arith.addf %106, %107 : vector<8x128xf32>
    %109 = arith.truncf %108 : vector<8x128xf32> to vector<8x128xbf16>
    %c24_41 = arith.constant 24 : index
    %c0_42 = arith.constant 0 : index
    %110 = vector.load %arg8[%c24_41, %c0_42] : memref<64x128xbf16, #tpu.memory_space<vmem>>, vector<8x128xbf16>
    tpu.vector_store %arg8[%c24_41, %c0_42], %109 {strides = array<i32>} : memref<64x128xbf16, #tpu.memory_space<vmem>>, vector<8x128xbf16>,
    %c32 = arith.constant 32 : index
    %c0_43 = arith.constant 0 : index
    %111 = vector.load %arg7[%c32, %c0_43] : memref<64x256xf32, #tpu.memory_space<vmem>>, vector<8x256xf32>
    %c0_44 = arith.constant 0 : index
    %c0_45 = arith.constant 0 : index
    %112 = vector.load %arg3[%c0_44, %c0_45] : memref<128x256xbf16, #tpu.memory_space<vmem>>, vector<128x256xbf16>
    %cst_46 = arith.constant dense<0.000000e+00> : vector<8x256xf32>
    %113 = tpu.matmul %109, %112, %cst_46 {dimension_numbers = #tpu.dot_dimension_numbers<[1], [0], [0], [1], [0, 0, 1, 1], [], []>} : vector<8x128xbf16>, vector<128x256xbf16>, vector<8x256xf32> -> vector<8x256xf32>
    %114 = vector.extract_strided_slice %111 {offsets = [0, 0], sizes = [8, 128], strides = [1, 1]} : vector<8x256xf32> to vector<8x128xf32>
    %115 = vector.extract_strided_slice %111 {offsets = [0, 128], sizes = [8, 128], strides = [1, 1]} : vector<8x256xf32> to vector<8x128xf32>
    %116 = vector.extract_strided_slice %113 {offsets = [0, 0], sizes = [8, 128], strides = [1, 1]} : vector<8x256xf32> to vector<8x128xf32>
    %117 = vector.extract_strided_slice %113 {offsets = [0, 128], sizes = [8, 128], strides = [1, 1]} : vector<8x256xf32> to vector<8x128xf32>
    %118 = arith.addf %115, %117 : vector<8x128xf32>
    %119 = arith.negf %118 : vector<8x128xf32>
    %120 = math.exp %119 : vector<8x128xf32>
    %cst_47 = arith.constant 1.000000e+00 : f32
    %121 = vector.broadcast %cst_47 : f32 to vector<8x128xf32>
    %122 = arith.addf %121, %120 : vector<8x128xf32>
    %123 = arith.divf %121, %122 : vector<8x128xf32>
    %c64_i32_48 = arith.constant 64 : i32
    %124 = tpu.dynamic_rotate %123 by %c64_i32_48 dim 1 : vector<8x128xf32>, i32 -> vector<8x128xf32>
    %125 = arith.mulf %124, %116 : vector<8x128xf32>
    %126 = arith.addf %114, %125 : vector<8x128xf32>
    %127 = math.tanh %126 : vector<8x128xf32>
    %cst_49 = arith.constant 1.000000e+00 : f32
    %128 = vector.broadcast %cst_49 : f32 to vector<8x128xf32>
    %129 = arith.subf %128, %123 : vector<8x128xf32>
    %130 = arith.mulf %129, %127 : vector<8x128xf32>
    %131 = arith.mulf %123, %108 : vector<8x128xf32>
    %132 = arith.addf %130, %131 : vector<8x128xf32>
    %133 = arith.truncf %132 : vector<8x128xf32> to vector<8x128xbf16>
    %c32_50 = arith.constant 32 : index
    %c0_51 = arith.constant 0 : index
    %134 = vector.load %arg8[%c32_50, %c0_51] : memref<64x128xbf16, #tpu.memory_space<vmem>>, vector<8x128xbf16>
    tpu.vector_store %arg8[%c32_50, %c0_51], %133 {strides = array<i32>} : memref<64x128xbf16, #tpu.memory_space<vmem>>, vector<8x128xbf16>,
    %c40 = arith.constant 40 : index
    %c0_52 = arith.constant 0 : index
    %135 = vector.load %arg7[%c40, %c0_52] : memref<64x256xf32, #tpu.memory_space<vmem>>, vector<8x256xf32>
    %c0_53 = arith.constant 0 : index
    %c0_54 = arith.constant 0 : index
    %136 = vector.load %arg3[%c0_53, %c0_54] : memref<128x256xbf16, #tpu.memory_space<vmem>>, vector<128x256xbf16>
    %cst_55 = arith.constant dense<0.000000e+00> : vector<8x256xf32>
    %137 = tpu.matmul %133, %136, %cst_55 {dimension_numbers = #tpu.dot_dimension_numbers<[1], [0], [0], [1], [0, 0, 1, 1], [], []>} : vector<8x128xbf16>, vector<128x256xbf16>, vector<8x256xf32> -> vector<8x256xf32>
    %138 = vector.extract_strided_slice %135 {offsets = [0, 0], sizes = [8, 128], strides = [1, 1]} : vector<8x256xf32> to vector<8x128xf32>
    %139 = vector.extract_strided_slice %135 {offsets = [0, 128], sizes = [8, 128], strides = [1, 1]} : vector<8x256xf32> to vector<8x128xf32>
    %140 = vector.extract_strided_slice %137 {offsets = [0, 0], sizes = [8, 128], strides = [1, 1]} : vector<8x256xf32> to vector<8x128xf32>
    %141 = vector.extract_strided_slice %137 {offsets = [0, 128], sizes = [8, 128], strides = [1, 1]} : vector<8x256xf32> to vector<8x128xf32>
    %142 = arith.addf %139, %141 : vector<8x128xf32>
    %143 = arith.negf %142 : vector<8x128xf32>
    %144 = math.exp %143 : vector<8x128xf32>
    %cst_56 = arith.constant 1.000000e+00 : f32
    %145 = vector.broadcast %cst_56 : f32 to vector<8x128xf32>
    %146 = arith.addf %145, %144 : vector<8x128xf32>
    %147 = arith.divf %145, %146 : vector<8x128xf32>
    %c64_i32_57 = arith.constant 64 : i32
    %148 = tpu.dynamic_rotate %147 by %c64_i32_57 dim 1 : vector<8x128xf32>, i32 -> vector<8x128xf32>
    %149 = arith.mulf %148, %140 : vector<8x128xf32>
    %150 = arith.addf %138, %149 : vector<8x128xf32>
    %151 = math.tanh %150 : vector<8x128xf32>
    %cst_58 = arith.constant 1.000000e+00 : f32
    %152 = vector.broadcast %cst_58 : f32 to vector<8x128xf32>
    %153 = arith.subf %152, %147 : vector<8x128xf32>
    %154 = arith.mulf %153, %151 : vector<8x128xf32>
    %155 = arith.mulf %147, %132 : vector<8x128xf32>
    %156 = arith.addf %154, %155 : vector<8x128xf32>
    %157 = arith.truncf %156 : vector<8x128xf32> to vector<8x128xbf16>
    %c40_59 = arith.constant 40 : index
    %c0_60 = arith.constant 0 : index
    %158 = vector.load %arg8[%c40_59, %c0_60] : memref<64x128xbf16, #tpu.memory_space<vmem>>, vector<8x128xbf16>
    tpu.vector_store %arg8[%c40_59, %c0_60], %157 {strides = array<i32>} : memref<64x128xbf16, #tpu.memory_space<vmem>>, vector<8x128xbf16>,
    %c48 = arith.constant 48 : index
    %c0_61 = arith.constant 0 : index
    %159 = vector.load %arg7[%c48, %c0_61] : memref<64x256xf32, #tpu.memory_space<vmem>>, vector<8x256xf32>
    %c0_62 = arith.constant 0 : index
    %c0_63 = arith.constant 0 : index
    %160 = vector.load %arg3[%c0_62, %c0_63] : memref<128x256xbf16, #tpu.memory_space<vmem>>, vector<128x256xbf16>
    %cst_64 = arith.constant dense<0.000000e+00> : vector<8x256xf32>
    %161 = tpu.matmul %157, %160, %cst_64 {dimension_numbers = #tpu.dot_dimension_numbers<[1], [0], [0], [1], [0, 0, 1, 1], [], []>} : vector<8x128xbf16>, vector<128x256xbf16>, vector<8x256xf32> -> vector<8x256xf32>
    %162 = vector.extract_strided_slice %159 {offsets = [0, 0], sizes = [8, 128], strides = [1, 1]} : vector<8x256xf32> to vector<8x128xf32>
    %163 = vector.extract_strided_slice %159 {offsets = [0, 128], sizes = [8, 128], strides = [1, 1]} : vector<8x256xf32> to vector<8x128xf32>
    %164 = vector.extract_strided_slice %161 {offsets = [0, 0], sizes = [8, 128], strides = [1, 1]} : vector<8x256xf32> to vector<8x128xf32>
    %165 = vector.extract_strided_slice %161 {offsets = [0, 128], sizes = [8, 128], strides = [1, 1]} : vector<8x256xf32> to vector<8x128xf32>
    %166 = arith.addf %163, %165 : vector<8x128xf32>
    %167 = arith.negf %166 : vector<8x128xf32>
    %168 = math.exp %167 : vector<8x128xf32>
    %cst_65 = arith.constant 1.000000e+00 : f32
    %169 = vector.broadcast %cst_65 : f32 to vector<8x128xf32>
    %170 = arith.addf %169, %168 : vector<8x128xf32>
    %171 = arith.divf %169, %170 : vector<8x128xf32>
    %c64_i32_66 = arith.constant 64 : i32
    %172 = tpu.dynamic_rotate %171 by %c64_i32_66 dim 1 : vector<8x128xf32>, i32 -> vector<8x128xf32>
    %173 = arith.mulf %172, %164 : vector<8x128xf32>
    %174 = arith.addf %162, %173 : vector<8x128xf32>
    %175 = math.tanh %174 : vector<8x128xf32>
    %cst_67 = arith.constant 1.000000e+00 : f32
    %176 = vector.broadcast %cst_67 : f32 to vector<8x128xf32>
    %177 = arith.subf %176, %171 : vector<8x128xf32>
    %178 = arith.mulf %177, %175 : vector<8x128xf32>
    %179 = arith.mulf %171, %156 : vector<8x128xf32>
    %180 = arith.addf %178, %179 : vector<8x128xf32>
    %181 = arith.truncf %180 : vector<8x128xf32> to vector<8x128xbf16>
    %c48_68 = arith.constant 48 : index
    %c0_69 = arith.constant 0 : index
    %182 = vector.load %arg8[%c48_68, %c0_69] : memref<64x128xbf16, #tpu.memory_space<vmem>>, vector<8x128xbf16>
    tpu.vector_store %arg8[%c48_68, %c0_69], %181 {strides = array<i32>} : memref<64x128xbf16, #tpu.memory_space<vmem>>, vector<8x128xbf16>,
    %c56 = arith.constant 56 : index
    %c0_70 = arith.constant 0 : index
    %183 = vector.load %arg7[%c56, %c0_70] : memref<64x256xf32, #tpu.memory_space<vmem>>, vector<8x256xf32>
    %c0_71 = arith.constant 0 : index
    %c0_72 = arith.constant 0 : index
    %184 = vector.load %arg3[%c0_71, %c0_72] : memref<128x256xbf16, #tpu.memory_space<vmem>>, vector<128x256xbf16>
    %cst_73 = arith.constant dense<0.000000e+00> : vector<8x256xf32>
    %185 = tpu.matmul %181, %184, %cst_73 {dimension_numbers = #tpu.dot_dimension_numbers<[1], [0], [0], [1], [0, 0, 1, 1], [], []>} : vector<8x128xbf16>, vector<128x256xbf16>, vector<8x256xf32> -> vector<8x256xf32>
    %186 = vector.extract_strided_slice %183 {offsets = [0, 0], sizes = [8, 128], strides = [1, 1]} : vector<8x256xf32> to vector<8x128xf32>
    %187 = vector.extract_strided_slice %183 {offsets = [0, 128], sizes = [8, 128], strides = [1, 1]} : vector<8x256xf32> to vector<8x128xf32>
    %188 = vector.extract_strided_slice %185 {offsets = [0, 0], sizes = [8, 128], strides = [1, 1]} : vector<8x256xf32> to vector<8x128xf32>
    %189 = vector.extract_strided_slice %185 {offsets = [0, 128], sizes = [8, 128], strides = [1, 1]} : vector<8x256xf32> to vector<8x128xf32>
    %190 = arith.addf %187, %189 : vector<8x128xf32>
    %191 = arith.negf %190 : vector<8x128xf32>
    %192 = math.exp %191 : vector<8x128xf32>
    %cst_74 = arith.constant 1.000000e+00 : f32
    %193 = vector.broadcast %cst_74 : f32 to vector<8x128xf32>
    %194 = arith.addf %193, %192 : vector<8x128xf32>
    %195 = arith.divf %193, %194 : vector<8x128xf32>
    %c64_i32_75 = arith.constant 64 : i32
    %196 = tpu.dynamic_rotate %195 by %c64_i32_75 dim 1 : vector<8x128xf32>, i32 -> vector<8x128xf32>
    %197 = arith.mulf %196, %188 : vector<8x128xf32>
    %198 = arith.addf %186, %197 : vector<8x128xf32>
    %199 = math.tanh %198 : vector<8x128xf32>
    %cst_76 = arith.constant 1.000000e+00 : f32
    %200 = vector.broadcast %cst_76 : f32 to vector<8x128xf32>
    %201 = arith.subf %200, %195 : vector<8x128xf32>
    %202 = arith.mulf %201, %199 : vector<8x128xf32>
    %203 = arith.mulf %195, %180 : vector<8x128xf32>
    %204 = arith.addf %202, %203 : vector<8x128xf32>
    %205 = arith.truncf %204 : vector<8x128xf32> to vector<8x128xbf16>
    %c56_77 = arith.constant 56 : index
    %c0_78 = arith.constant 0 : index
    %206 = vector.load %arg8[%c56_77, %c0_78] : memref<64x128xbf16, #tpu.memory_space<vmem>>, vector<8x128xbf16>
    tpu.vector_store %arg8[%c56_77, %c0_78], %205 {strides = array<i32>} : memref<64x128xbf16, #tpu.memory_space<vmem>>, vector<8x128xbf16>,
    %c0_79 = arith.constant 0 : index
    %c0_80 = arith.constant 0 : index
    %207 = vector.load %arg6[%c0_79, %c0_80] : memref<8x128xf32, #tpu.memory_space<vmem>>, vector<8x128xf32>
    tpu.vector_store %arg6[%c0_79, %c0_80], %204 {strides = array<i32>} : memref<8x128xf32, #tpu.memory_space<vmem>>, vector<8x128xf32>,
    %c0_81 = arith.constant 0 : index
    %c0_82 = arith.constant 0 : index
    %208 = vector.load %arg8[%c0_81, %c0_82] : memref<64x128xbf16, #tpu.memory_space<vmem>>, vector<64x128xbf16>
    %c0_83 = arith.constant 0 : index
    %c0_84 = arith.constant 0 : index
    %209 = vector.load %arg4[%c0_83, %c0_84] : memref<128x128xbf16, #tpu.memory_space<vmem>>, vector<128x128xbf16>
    %cst_85 = arith.constant dense<0.000000e+00> : vector<64x128xf32>
    %210 = tpu.matmul %208, %209, %cst_85 {dimension_numbers = #tpu.dot_dimension_numbers<[1], [0], [0], [1], [0, 0, 1, 1], [], []>} : vector<64x128xbf16>, vector<128x128xbf16>, vector<64x128xf32> -> vector<64x128xf32>
    %c0_86 = arith.constant 0 : index
    %c0_87 = arith.constant 0 : index
    %211 = vector.load %arg5[%c0_86, %c0_87] : memref<64x128xf32, #tpu.memory_space<vmem>>, vector<64x128xf32>
    tpu.vector_store %arg5[%c0_86, %c0_87], %210 {strides = array<i32>} : memref<64x128xf32, #tpu.memory_space<vmem>>, vector<64x128xf32>,
    return
  }
}

</mosaic_0001>

<bundles_post_ra>
// kernel: forward.1
= control target key start
LH: loop header
LB: loop body
LE: loop exit
PB: predicated region body
PF: predicated region fallthrough
CT: control target
= control target key end

     0   :  { %v2044_v0 = vmov 0   ;;  %v31_v43 = vlaneseq  ;;  %v2045_v49 = vmov 1.0|1.0   ;;  %s2046_s27 = smov 64   ;;  %s2549_s0 = inlined_call_operand.vmem [shape: s32[64,1], index: 0, kind: input, shape index: {}]   ;;  %s2550_s3 = inlined_call_operand.vmem [shape: bf16[128,256], index: 3, kind: input, shape index: {}]   ;;  %s2551_s2 = inlined_call_operand.vmem [shape: bf16[128,256], index: 2, kind: input, shape index: {}]   ;;  %s2552_s1 = inlined_call_operand.vmem [shape: f32[8,128], index: 1, kind: input, shape index: {}]   ;;  %s2553_s4 = inlined_call_operand.vmem [shape: bf16[128,128], index: 4, kind: input, shape index: {}]   ;;  %s2554_s5 = inlined_call_operand.vmem [shape: f32[64,128], index: 5, kind: output, shape index: {0}]   ;;  %s2555_s6 = inlined_call_operand.vmem [shape: f32[8,128], index: 6, kind: output, shape index: {1}]  }
   0x1   :  { %1915 = vset.pattern.permute.xlu1 %v2044_v0  ;;  %1914 = vset.pattern.permute.xlu0 %v2044_v0  ;;  %v25_v1 = vld [vmem:[%s2549_s0 + $0x10] sm:$0xff]  ;;  %v23_v2 = vld [vmem:[%s2549_s0] sm:$0xff]  ;;  %v26_v3 = vld [vmem:[%s2549_s0 + $0x18] sm:$0xff] }
   0x2   :  { %40 = vperm.xlu1 %1915, %v25_v1   ;;  %34 = vperm.xlu0 %1914, %v23_v2   ;;  %v24_v4 = vld [vmem:[%s2549_s0 + $0x8] sm:$0xff]  ;;  %v27_v8 = vld [vmem:[%s2549_s0 + $0x20] sm:$0xff]  ;;  %v2124_v11 = vld [vmem:[%s2550_s3 + $0x14] ss:$8 sps:$4 sm:$0xff]   ;;  %v2274_v44 = vand.u32 127, %v31_v43 }
   0x3   :  { %v2099_v5 = vld [vmem:[%s2550_s3 + $0x4] ss:$8 sps:$4 sm:$0xff]   ;;  %411 = vmatprep.mubr.bf16.mxu1 %v2044_v0  ;;  %222 = vmatprep.mubr.bf16.mxu0 %v2044_v0  ;;  %v2106_v6 = vld [vmem:[%s2550_s3] ss:$8 sps:$4 sm:$0xff]   ;;  %v2129_v12 = vld [vmem:[%s2550_s3 + $0x10] ss:$8 sps:$4 sm:$0xff]  }
   0x4   :  { %v28_v7 = vld [vmem:[%s2549_s0 + $0x28] sm:$0xff]  ;;  %379 = vmatprep.subr.bf16.mxu1 %v2099_v5  ;;  %v1925_v13 = vld [vmem:[%s2551_s2 + $0x14] ss:$8 sps:$4 sm:$0xff]   ;;  %v1927_v14 = vld [vmem:[%s2551_s2 + $0x10] ss:$8 sps:$4 sm:$0xff]   ;;  %vm65_vm0 = vcmp.eq.s32.totalorder %v2274_v44, 127 }
   0x5   :  { %v1919_v9 = vld [vmem:[%s2551_s2 + $0x4] ss:$8 sps:$4 sm:$0xff]   ;;  %v1921_v10 = vld [vmem:[%s2551_s2] ss:$8 sps:$4 sm:$0xff]   ;;  %380 = vmatpush1.bf16.msra.mxu1 %v2106_v6  ;;  %v2160_v21 = vld [vmem:[%s2550_s3 + $0x34] ss:$8 sps:$4 sm:$0xff]  }
   0x6   :  { %43 = vperm.xlu1 %1915, %v26_v3   ;;  %37 = vperm.xlu0 %1914, %v24_v4   ;;  %v287_v15 = vld [vmem:[%s2550_s3 + $0x20] sm:$0xff]  ;;  %v288_v16 = vld [vmem:[%s2550_s3 + $0x28] sm:$0xff]  ;;  %v1936_v22 = vld [vmem:[%s2551_s2 + $0x34] ss:$8 sps:$4 sm:$0xff]  }
   0x7   :  { %190 = vmatprep.subr.bf16.mxu0 %v1919_v9  ;;  %381 = vmatprep.subr.bf16.mxu1 %v2124_v11  ;;  %v2145_v17 = vcombine.high %v287_v15, %v288_v16  ;;  %v1930_v18 = vld [vmem:[%s2551_s2 + $0x24] ss:$8 sps:$4 sm:$0xff]   ;;  %v2151_v19 = vcombine.low %v287_v15, %v288_v16  ;;  %v1932_v20 = vld [vmem:[%s2551_s2 + $0x20] ss:$8 sps:$4 sm:$0xff]   ;;  %v2169_v23 = vld [vmem:[%s2550_s3 + $0x30] ss:$8 sps:$4 sm:$0xff]  }
   0x8   :  { %191 = vmatpush1.bf16.msra.mxu0 %v1921_v10  ;;  %v1938_v24 = vld [vmem:[%s2551_s2 + $0x30] ss:$8 sps:$4 sm:$0xff]   ;;  %v2178_v25 = vld [vmem:[%s2550_s3 + $0x44] ss:$8 sps:$4 sm:$0xff]   ;;  %v2187_v27 = vld [vmem:[%s2550_s3 + $0x40] ss:$8 sps:$4 sm:$0xff]  }
   0x9   :  { %192 = vmatprep.subr.bf16.mxu0 %v1925_v13  ;;  %382 = vmatpush1.bf16.msra.mxu1 %v2129_v12  ;;  %v1942_v26 = vld [vmem:[%s2551_s2 + $0x44] ss:$8 sps:$4 sm:$0xff]   ;;  %v1944_v28 = vld [vmem:[%s2551_s2 + $0x40] ss:$8 sps:$4 sm:$0xff]   ;;  %v2196_v29 = vld [vmem:[%s2550_s3 + $0x54] ss:$8 sps:$4 sm:$0xff]  }
   0xa   :  { %49 = vperm.xlu1 %1915, %v28_v7   ;;  %46 = vperm.xlu0 %1914, %v27_v8   ;;  %v1948_v30 = vld [vmem:[%s2551_s2 + $0x54] ss:$8 sps:$4 sm:$0xff]   ;;  %v2204_v31 = vld [vmem:[%s2550_s3 + $0x50] ss:$8 sps:$4 sm:$0xff]   ;;  %v2213_v33 = vld [vmem:[%s2550_s3 + $0x64] ss:$8 sps:$4 sm:$0xff]  }
   0xb   :  { %383 = vmatprep.subr.bf16.mxu1 %v2145_v17  ;;  %v1950_v32 = vld [vmem:[%s2551_s2 + $0x50] ss:$8 sps:$4 sm:$0xff]   ;;  %v1954_v34 = vld [vmem:[%s2551_s2 + $0x64] ss:$8 sps:$4 sm:$0xff]   ;;  %v2222_v35 = vld [vmem:[%s2550_s3 + $0x60] ss:$8 sps:$4 sm:$0xff]  }
   0xc   :  { %193 = vmatpush1.bf16.msra.mxu0 %v1927_v14  ;;  %v1956_v36 = vld [vmem:[%s2551_s2 + $0x60] ss:$8 sps:$4 sm:$0xff]   ;;  %v2230_v37 = vld [vmem:[%s2550_s3 + $0x74] ss:$8 sps:$4 sm:$0xff]   ;;  %v2241_v39 = vld [vmem:[%s2550_s3 + $0x70] ss:$8 sps:$4 sm:$0xff]  }
   0xd   :  { %194 = vmatprep.subr.bf16.mxu0 %v1930_v18  ;;  %384 = vmatpush1.bf16.msra.mxu1 %v2151_v19  ;;  %v1960_v38 = vld [vmem:[%s2551_s2 + $0x74] ss:$8 sps:$4 sm:$0xff]   ;;  %v2246_v40 = vld [vmem:[%s2552_s1] sm:$0xff]  ;;  %v1962_v41 = vld [vmem:[%s2551_s2 + $0x70] ss:$8 sps:$4 sm:$0xff]  }
   0xe   :  { %385 = vmatprep.subr.bf16.mxu1 %v2160_v21  ;;  %v280_v42 = vpack.c.bf16 %v2246_v40, %v2246_v40  ;;  %v29_v52 = vld [vmem:[%s2549_s0 + $0x30] sm:$0xff]  ;;  %v30_v15 = vld [vmem:[%s2549_s0 + $0x38] sm:$0xff] }
   0xf   :  { %52 = vperm.xlu1 %1915, %v29_v52  }
  0x10   :  { %195 = vmatpush1.bf16.msra.mxu0 %v1932_v20 }
  0x11   :  { %196 = vmatprep.subr.bf16.mxu0 %v1936_v22  ;;  %386 = vmatpush1.bf16.msra.mxu1 %v2169_v23 }
  0x12   :  { %387 = vmatprep.subr.bf16.mxu1 %v2178_v25 }
  0x14   :  { %197 = vmatpush1.bf16.msra.mxu0 %v1938_v24 }
  0x15   :  { %198 = vmatprep.subr.bf16.mxu0 %v1942_v26  ;;  %388 = vmatpush1.bf16.msra.mxu1 %v2187_v27 }
  0x16   :  { %389 = vmatprep.subr.bf16.mxu1 %v2196_v29 }
  0x18   :  { %199 = vmatpush1.bf16.msra.mxu0 %v1944_v28 }
  0x19   :  { %200 = vmatprep.subr.bf16.mxu0 %v1948_v30  ;;  %390 = vmatpush1.bf16.msra.mxu1 %v2204_v31 }
  0x1a   :  { %391 = vmatprep.subr.bf16.mxu1 %v2213_v33 }
  0x1c   :  { %201 = vmatpush1.bf16.msra.mxu0 %v1950_v32 }
  0x1d   :  { %202 = vmatprep.subr.bf16.mxu0 %v1954_v34  ;;  %392 = vmatpush1.bf16.msra.mxu1 %v2222_v35 }
  0x1e   :  { %393 = vmatprep.subr.bf16.mxu1 %v2230_v37 }
  0x20   :  { %203 = vmatpush1.bf16.msra.mxu0 %v1956_v36 }
  0x21   :  { %204 = vmatprep.subr.bf16.mxu0 %v1960_v38  ;;  %394 = vmatpush1.bf16.msra.mxu1 %v2241_v39 }
  0x22   :  { %696 = vmatprep.subr.bf16.mxu1 %v2099_v5 }
  0x24   :  { %205 = vmatpush1.bf16.msra.mxu0 %v1962_v41  ;;  %412 = vmatmul.mubr.bf16.vlgmr.msra.gmra.mrb[0].mxu1 %v280_v42 }
  0x25   :  { %536 = vmatprep.subr.bf16.mxu0 %v2099_v5  ;;  %697 = vmatpush1.bf16.msra.mxu1 %v2106_v6 }
  0x26   :  { %728 = vmatprep.mubr.bf16.mxu1 %v2044_v0  ;;  %698 = vmatprep.subr.bf16.mxu1 %v2124_v11 }
  0x29   :  { %699 = vmatpush1.bf16.msra.mxu1 %v2129_v12 }
  0x2a   :  { %700 = vmatprep.subr.bf16.mxu1 %v2145_v17 }
  0x2d   :  { %701 = vmatpush1.bf16.msra.mxu1 %v2151_v19 }
  0x2e   :  { %702 = vmatprep.subr.bf16.mxu1 %v2160_v21 }
  0x31   :  { %703 = vmatpush1.bf16.msra.mxu1 %v2169_v23 }
  0x32   :  { %704 = vmatprep.subr.bf16.mxu1 %v2178_v25 }
  0x35   :  { %705 = vmatpush1.bf16.msra.mxu1 %v2187_v27 }
  0x36   :  { %706 = vmatprep.subr.bf16.mxu1 %v2196_v29 }
  0x39   :  { %707 = vmatpush1.bf16.msra.mxu1 %v2204_v31 }
  0x3a   :  { %708 = vmatprep.subr.bf16.mxu1 %v2213_v33 }
  0x3d   :  { %709 = vmatpush1.bf16.msra.mxu1 %v2222_v35 }
  0x3e   :  { %710 = vmatprep.subr.bf16.mxu1 %v2230_v37 }
  0x41   :  { %711 = vmatpush1.bf16.msra.mxu1 %v2241_v39 }
  0x42   :  { %1013 = vmatprep.subr.bf16.mxu1 %v2099_v5 }
  0x81   :  { %v35_v45 = vpop.permute.xlu0 %34  ;;  %v41_v46 = vpop.permute.xlu1 %40 }
  0x82   :  { %vm57_vm1 = vcmp.eq.s32.totalorder %v2274_v44, %v35_v45  ;;  %vm59_vm4 = vcmp.eq.s32.totalorder %v2274_v44, %v41_v46 }
  0x83   :  { %vm66_vm3 = vmor %vm57_vm1, %vm65_vm0 }
  0x84   :  { %vm68_vm8 = vmor %vm59_vm4, %vm65_vm0 }
  0x85   :  { %v38_v47 = vpop.permute.xlu0 %37  ;;  %v44_v48 = vpop.permute.xlu1 %43 }
  0x86   :  { %vm58_vm2 = vcmp.eq.s32.totalorder %v2274_v44, %v38_v47  ;;  %vm60_vm6 = vcmp.eq.s32.totalorder %v2274_v44, %v44_v48 }
  0x87   :  { %vm67_vm5 = vmor %vm58_vm2, %vm65_vm0 }
  0x88   :  { %vm1723_vm7 = vmpackc.low %vm67_vm5, %vm66_vm3 }
  0x89   :  { %1724 = vmatmul.mubr.msk.bf16.vlgmr.msra.gmra.mrb[0].mxu0 %vm1723_vm7, %v2045_v49  ;;  %vm69_vm9 = vmor %vm60_vm6, %vm65_vm0  ;;  %v50_v50 = vpop.permute.xlu1 %49  ;;  %v47_v51 = vpop.permute.xlu0 %46 }
  0x8a   :  { %232 = vmatprep.mubr.bf16.mxu0 %v2044_v0  ;;  %537 = vmatpush1.bf16.msra.mxu0 %v2106_v6  ;;  %vm1725_vm10 = vmpackc.low %vm69_vm9, %vm68_vm8  ;;  %vm62_vm11 = vcmp.eq.s32.totalorder %v2274_v44, %v50_v50  ;;  %vm61_vm12 = vcmp.eq.s32.totalorder %v2274_v44, %v47_v51 }
  0x8b   :  { %538 = vmatprep.subr.bf16.mxu0 %v2124_v11  ;;  %vm71_vm13 = vmor %vm62_vm11, %vm65_vm0 }
  0x8c   :  { %vm70_vm14 = vmor %vm61_vm12, %vm65_vm0 }
  0x8d   :  { %vm1727_vm15 = vmpackc.low %vm71_vm13, %vm70_vm14 }
  0x8e   :  { %539 = vmatpush1.bf16.msra.mxu0 %v2129_v12  ;;  %v53_v22 = vpop.permute.xlu1 %52 }
  0x8f   :  { %540 = vmatprep.subr.bf16.mxu0 %v2145_v17  ;;  %vm63_vm1 = vcmp.eq.s32.totalorder %v2274_v44, %v53_v22 }
  0x90   :  { %vm72_vm2 = vmor %vm63_vm1, %vm65_vm0 }
  0x91   :  { %1726 = vmatmul.mubr.msk.bf16.gmra.mrb[4].mxu0 %vm1725_vm10, %v2045_v49 }
  0x92   :  { %242 = vmatprep.mubr.bf16.mxu0 %v2044_v0  ;;  %541 = vmatpush1.bf16.msra.mxu0 %v2151_v19 }
  0x93   :  { %542 = vmatprep.subr.bf16.mxu0 %v2160_v21 }
  0x96   :  { %543 = vmatpush1.bf16.msra.mxu0 %v2169_v23 }
  0x97   :  { %544 = vmatprep.subr.bf16.mxu0 %v2178_v25 }
  0x99   :  { %1728 = vmatmul.mubr.msk.bf16.gmra.mrb[8].mxu0 %vm1727_vm15, %v2045_v49 }
  0x9a   :  { %545 = vmatpush1.bf16.msra.mxu0 %v2187_v27  ;;  %252 = vmatprep.mubr.bf16.mxu0 %v2044_v0 }
  0x9b   :  { %546 = vmatprep.subr.bf16.mxu0 %v2196_v29 }
  0x9e   :  { %547 = vmatpush1.bf16.msra.mxu0 %v2204_v31 }
  0x9f   :  { %548 = vmatprep.subr.bf16.mxu0 %v2213_v33 }
  0xa2   :  { %549 = vmatpush1.bf16.msra.mxu0 %v2222_v35 }
  0xa3   :  { %550 = vmatprep.subr.bf16.mxu0 %v2230_v37 }
  0xa6   :  { %551 = vmatpush1.bf16.msra.mxu0 %v2241_v39 }
  0xa7   :  { %853 = vmatprep.subr.bf16.mxu0 %v2099_v5 }
  0xf7   :  { %v413_v53 = vpop.f32.mrb[0].mxu1 }
  0xf8   :  { %v415_v54 = vpop.f32.mrb[1].mxu1 }
  0xf9   :  { %v417_v55 = vpop.f32.mrb[2].mxu1 }
  0xfa   :  { %v418_v56 = vpop.f32.mrb[3].mxu1 }
 0x15c   :  { %v224_v57 = vpop.f32.mrb[0].mxu0 }
 0x15d   :  { %v226_v58 = vpop.f32.mrb[1].mxu0 }
 0x15e   :  { %v420_v59 = vadd.f32 %v415_v54, %v226_v58  ;;  %v2320_v60 = vpop.f32.mrb[2].mxu0 }
 0x15f   :  { %v2322_v61 = vpop.f32.mrb[3].mxu0 }
 0x160   :  { %v1747_v62 = vmul.f32 -1.442695, %v420_v59 }
 0x162   :  { %1996 = vpow2.f32 %v1747_v62 }
 0x164   :  { %v2324_v63 = vpop.f32.mrb[4].mxu0 }
 0x165   :  { %v2326_v1 = vpop.f32.mrb[5].mxu0 }
 0x166   :  { %v2328_v2 = vpop.f32.mrb[6].mxu0 }
 0x167   :  { %v2330_v3 = vpop.f32.mrb[7].mxu0 }
 0x16c   :  { %v1997_v4 = vpop.eup %1996  ;;  %v2332_v7 = vpop.f32.mrb[8].mxu0 }
 0x16d   :  { %v424_v8 = vadd.f32 1.0, %v1997_v4  ;;  %v2334_v9 = vpop.f32.mrb[9].mxu0 }
 0x16e   :  { %v2336_v10 = vpop.f32.mrb[10].mxu0 }
 0x16f   :  { %1998 = vrcp.f32 %v424_v8  ;;  %v2338_v13 = vpop.f32.mrb[11].mxu0 }
 0x179   :  { %v1999_v14 = vpop.eup %1998 }
 0x17a   :  { %427 = vrot.lane.b32.xlu0 %v1999_v14, %s2046_s27  ;;  %v432_v24 = vsub.f32 1.0, %v1999_v14  ;;  %v434_v30 = vmul.f32 %v1999_v14, %v2246_v40 }
 0x17e   :  { %55 = vperm.xlu0 %1914, %v30_v15  }
 0x1ec   :  { %v428_v16 = vpop.permute.xlu0 %427 }
 0x1ed   :  { %v429_v18 = vmul.f32 %v428_v16, %v413_v53 }
 0x1ef   :  { %v430_v20 = vadd.f32 %v429_v18, %v224_v57 }
 0x1f1   :  { %2000 = vtanh.f32 %v430_v20 }
 0x1fb   :  { %v2001_v26 = vpop.eup %2000 }
 0x1fc   :  { %v433_v28 = vmul.f32 %v2001_v26, %v432_v24 }
 0x1fd   :  { %v56_v32 = vpop.permute.xlu0 %55 }
 0x1fe   :  { %vm64_vm3 = vcmp.eq.s32.totalorder %v2274_v44, %v56_v32  ;;  %v435_v34 = vadd.f32 %v434_v30, %v433_v28 }
 0x1ff   :  { %vm73_vm4 = vmor %vm64_vm3, %vm65_vm0 }
 0x200   :  { %vm1729_vm5 = vmpackc.low %vm73_vm4, %vm72_vm2  ;;  %v436_v36 = vpack.c.bf16 %v435_v34, %v435_v34 }
 0x201   :  { %1730 = vmatmul.mubr.msk.bf16.gmra.mrb[12].mxu0 %vm1729_vm5, %v2045_v49 }
 0x202   :  { %568 = vmatprep.mubr.bf16.mxu0 %v2044_v0  ;;  %437 = vst [vmem:[#allocation3] sm:$0xf] %v436_v36 }
 0x209   :  { %569 = vmatmul.mubr.bf16.vlgmr.msra.gmra.mrb[16].mxu0 %v436_v36 }
 0x20a   :  { %854 = vmatpush1.bf16.msra.mxu0 %v2106_v6  ;;  %885 = vmatprep.mubr.bf16.mxu0 %v2044_v0 }
 0x20b   :  { %855 = vmatprep.subr.bf16.mxu0 %v2124_v11 }
 0x20e   :  { %856 = vmatpush1.bf16.msra.mxu0 %v2129_v12 }
 0x20f   :  { %857 = vmatprep.subr.bf16.mxu0 %v2145_v17 }
 0x212   :  { %858 = vmatpush1.bf16.msra.mxu0 %v2151_v19 }
 0x213   :  { %859 = vmatprep.subr.bf16.mxu0 %v2160_v21 }
 0x216   :  { %860 = vmatpush1.bf16.msra.mxu0 %v2169_v23 }
 0x217   :  { %861 = vmatprep.subr.bf16.mxu0 %v2178_v25 }
 0x21a   :  { %862 = vmatpush1.bf16.msra.mxu0 %v2187_v27 }
 0x21b   :  { %863 = vmatprep.subr.bf16.mxu0 %v2196_v29 }
 0x21e   :  { %864 = vmatpush1.bf16.msra.mxu0 %v2204_v31 }
 0x21f   :  { %865 = vmatprep.subr.bf16.mxu0 %v2213_v33 }
 0x222   :  { %866 = vmatpush1.bf16.msra.mxu0 %v2222_v35 }
 0x223   :  { %867 = vmatprep.subr.bf16.mxu0 %v2230_v37 }
 0x226   :  { %868 = vmatpush1.bf16.msra.mxu0 %v2241_v39 }
 0x227   :  { %1170 = vmatprep.subr.bf16.mxu0 %v2099_v5 }
 0x2d4   :  { %v2370_v38 = vpop.f32.mrb[12].mxu0 }
 0x2d5   :  { %v2372_v40 = vpop.f32.mrb[13].mxu0 }
 0x2d6   :  { %v2374_v41 = vpop.f32.mrb[14].mxu0 }
 0x2d7   :  { %v2376_v42 = vpop.f32.mrb[15].mxu0 }
 0x2dc   :  { %v570_v43 = vpop.f32.mrb[16].mxu0 }
 0x2dd   :  { %v572_v44 = vpop.f32.mrb[17].mxu0 }
 0x2de   :  { %v577_v45 = vadd.f32 %v572_v44, %v2322_v61  ;;  %v574_v46 = vpop.f32.mrb[18].mxu0 }
 0x2df   :  { %v575_v47 = vpop.f32.mrb[19].mxu0 }
 0x2e0   :  { %v1764_v48 = vmul.f32 -1.442695, %v577_v45 }
 0x2e2   :  { %2002 = vpow2.f32 %v1764_v48 }
 0x2ec   :  { %v2003_v49 = vpop.eup %2002 }
 0x2ed   :  { %v581_v50 = vadd.f32 1.0, %v2003_v49 }
 0x2ef   :  { %2004 = vrcp.f32 %v581_v50 }
 0x2f9   :  { %v2005_v5 = vpop.eup %2004 }
 0x2fa   :  { %584 = vrot.lane.b32.xlu1 %v2005_v5, %s2046_s27  ;;  %v589_v54 = vsub.f32 1.0, %v2005_v5  ;;  %v591_v57 = vmul.f32 %v2005_v5, %v435_v34 }
 0x36c   :  { %v585_v51 = vpop.permute.xlu1 %584 }
 0x36d   :  { %v586_v52 = vmul.f32 %v585_v51, %v570_v43 }
 0x36f   :  { %v587_v53 = vadd.f32 %v586_v52, %v2320_v60 }
 0x371   :  { %2006 = vtanh.f32 %v587_v53 }
 0x37b   :  { %v2007_v55 = vpop.eup %2006 }
 0x37c   :  { %v590_v56 = vmul.f32 %v2007_v55, %v589_v54 }
 0x37e   :  { %v592_v58 = vadd.f32 %v591_v57, %v590_v56 }
 0x380   :  { %v593_v59 = vpack.c.bf16 %v592_v58, %v592_v58 }
 0x382   :  { %v595_v61 = vrot.slane %v593_v59, 4  ;;  %729 = vmatmul.mubr.bf16.vlgmr.msra.gmra.mrb[4].mxu1 %v593_v59 }
 0x383   :  { %1014 = vmatpush1.bf16.msra.mxu1 %v2106_v6  ;;  %1045 = vmatprep.mubr.bf16.mxu1 %v2044_v0 }
 0x384   :  { %597 = vst [vmem:[#allocation3] sm:$0xf0] %v595_v61  ;;  %1015 = vmatprep.subr.bf16.mxu1 %v2124_v11 }
 0x387   :  { %1016 = vmatpush1.bf16.msra.mxu1 %v2129_v12 }
 0x388   :  { %1017 = vmatprep.subr.bf16.mxu1 %v2145_v17 }
 0x38b   :  { %1018 = vmatpush1.bf16.msra.mxu1 %v2151_v19 }
 0x38c   :  { %1019 = vmatprep.subr.bf16.mxu1 %v2160_v21 }
 0x38f   :  { %1020 = vmatpush1.bf16.msra.mxu1 %v2169_v23 }
 0x390   :  { %1021 = vmatprep.subr.bf16.mxu1 %v2178_v25 }
 0x393   :  { %1022 = vmatpush1.bf16.msra.mxu1 %v2187_v27 }
 0x394   :  { %1023 = vmatprep.subr.bf16.mxu1 %v2196_v29 }
 0x397   :  { %1024 = vmatpush1.bf16.msra.mxu1 %v2204_v31 }
 0x398   :  { %1025 = vmatprep.subr.bf16.mxu1 %v2213_v33 }
 0x39b   :  { %1026 = vmatpush1.bf16.msra.mxu1 %v2222_v35 }
 0x39c   :  { %1027 = vmatprep.subr.bf16.mxu1 %v2230_v37 }
 0x39f   :  { %1028 = vmatpush1.bf16.msra.mxu1 %v2241_v39 }
 0x455   :  { %v730_v60 = vpop.f32.mrb[4].mxu1 }
 0x456   :  { %v732_v62 = vpop.f32.mrb[5].mxu1 }
 0x457   :  { %v737_v4 = vadd.f32 %v732_v62, %v2326_v1  ;;  %v734_v8 = vpop.f32.mrb[6].mxu1 }
 0x458   :  { %v735_v14 = vpop.f32.mrb[7].mxu1 }
 0x459   :  { %v1781_v15 = vmul.f32 -1.442695, %v737_v4 }
 0x45b   :  { %2008 = vpow2.f32 %v1781_v15 }
 0x465   :  { %v2009_v16 = vpop.eup %2008 }
 0x466   :  { %v741_v18 = vadd.f32 1.0, %v2009_v16 }
 0x468   :  { %2010 = vrcp.f32 %v741_v18 }
 0x472   :  { %v2011_v20 = vpop.eup %2010 }
 0x473   :  { %744 = vrot.lane.b32.xlu0 %v2011_v20, %s2046_s27  ;;  %v749_v28 = vsub.f32 1.0, %v2011_v20  ;;  %v751_v34 = vmul.f32 %v2011_v20, %v592_v58 }
 0x4e5   :  { %v745_v22 = vpop.permute.xlu0 %744 }
 0x4e6   :  { %v746_v24 = vmul.f32 %v745_v22, %v730_v60 }
 0x4e8   :  { %v747_v26 = vadd.f32 %v746_v24, %v2324_v63 }
 0x4ea   :  { %2012 = vtanh.f32 %v747_v26  ;;  %v1963_v26 = vld [vmem:[%s2550_s3] ss:$8 sps:$4 sm:$0xff]  }
 0x4f4   :  { %v2013_v30 = vpop.eup %2012 }
 0x4f5   :  { %v750_v32 = vmul.f32 %v2013_v30, %v749_v28  ;;  %v1965_v28 = vld [vmem:[%s2550_s3 + $0x4] ss:$8 sps:$4 sm:$0xff]   ;;  %v1966_v30 = vld [vmem:[%s2550_s3 + $0x10] ss:$8 sps:$4 sm:$0xff]  }
 0x4f6   :  { %1330 = vmatprep.subr.bf16.mxu1 %v1965_v28 }
 0x4f7   :  { %v752_v1 = vadd.f32 %v751_v34, %v750_v32 }
 0x4f9   :  { %v753_v36 = vpack.c.bf16 %v752_v1, %v752_v1 }
 0x4fb   :  { %754 = vst [vmem:[#allocation3 + $0x8] sm:$0xf] %v753_v36  ;;  %886 = vmatmul.mubr.bf16.vlgmr.msra.gmra.mrb[20].mxu0 %v753_v36 }
 0x4fc   :  { %1171 = vmatpush1.bf16.msra.mxu0 %v2106_v6  ;;  %1202 = vmatprep.mubr.bf16.mxu0 %v2044_v0 }
 0x4fd   :  { %1172 = vmatprep.subr.bf16.mxu0 %v2124_v11 }
 0x500   :  { %1173 = vmatpush1.bf16.msra.mxu0 %v2129_v12 }
 0x501   :  { %1174 = vmatprep.subr.bf16.mxu0 %v2145_v17 }
 0x504   :  { %1175 = vmatpush1.bf16.msra.mxu0 %v2151_v19 }
 0x505   :  { %1176 = vmatprep.subr.bf16.mxu0 %v2160_v21 }
 0x508   :  { %1177 = vmatpush1.bf16.msra.mxu0 %v2169_v23 }
 0x509   :  { %1178 = vmatprep.subr.bf16.mxu0 %v2178_v25 }
 0x50c   :  { %1179 = vmatpush1.bf16.msra.mxu0 %v2187_v27 }
 0x50d   :  { %1180 = vmatprep.subr.bf16.mxu0 %v2196_v29 }
 0x510   :  { %1181 = vmatpush1.bf16.msra.mxu0 %v2204_v31 }
 0x511   :  { %1182 = vmatprep.subr.bf16.mxu0 %v2213_v33 }
 0x514   :  { %1183 = vmatpush1.bf16.msra.mxu0 %v2222_v35 }
 0x515   :  { %1184 = vmatprep.subr.bf16.mxu0 %v2230_v37 }
 0x518   :  { %1185 = vmatpush1.bf16.msra.mxu0 %v2241_v39 }
 0x519   :  { %1487 = vmatprep.subr.bf16.mxu0 %v1965_v28 }
 0x5ce   :  { %v887_v6 = vpop.f32.mrb[20].mxu0 }
 0x5cf   :  { %v889_v11 = vpop.f32.mrb[21].mxu0 }
 0x5d0   :  { %v894_v12 = vadd.f32 %v889_v11, %v2330_v3  ;;  %v891_v63 = vpop.f32.mrb[22].mxu0  ;;  %v1971_v11 = vld [vmem:[%s2553_s4 + $0x8] sm:$0xff]  }
 0x5d1   :  { %v892_v43 = vpop.f32.mrb[23].mxu0  ;;  %v1550_v63 = vld [vmem:[#allocation3] sm:$0xff] }
 0x5d2   :  { %v1798_v44 = vmul.f32 -1.442695, %v894_v12  ;;  %v1973_v43 = vld [vmem:[%s2553_s4 + $0x18] sm:$0xff]  }
 0x5d4   :  { %2014 = vpow2.f32 %v1798_v44  ;;  %v1974_v44 = vld [vmem:[%s2553_s4 + $0x20] sm:$0xff]  }
 0x5de   :  { %v2015_v45 = vpop.eup %2014 }
 0x5df   :  { %v898_v46 = vadd.f32 1.0, %v2015_v45  ;;  %v1975_v45 = vld [vmem:[%s2553_s4 + $0x28] sm:$0xff]  }
 0x5e1   :  { %2016 = vrcp.f32 %v898_v46  ;;  %v1976_v46 = vld [vmem:[%s2553_s4 + $0x30] sm:$0xff]  }
 0x5eb   :  { %v2017_v47 = vpop.eup %2016 }
 0x5ec   :  { %901 = vrot.lane.b32.xlu1 %v2017_v47, %s2046_s27  ;;  %v906_v5 = vsub.f32 1.0, %v2017_v47  ;;  %v908_v53 = vmul.f32 %v2017_v47, %v752_v1  ;;  %v1977_v47 = vld [vmem:[%s2553_s4 + $0x38] sm:$0xff]  }
 0x65e   :  { %v902_v48 = vpop.permute.xlu1 %901 }
 0x65f   :  { %v903_v49 = vmul.f32 %v902_v48, %v887_v6 }
 0x661   :  { %v904_v50 = vadd.f32 %v903_v49, %v2328_v2 }
 0x663   :  { %2018 = vtanh.f32 %v904_v50  ;;  %v1978_v50 = vld [vmem:[%s2550_s3 + $0x20] ss:$8 sps:$4 sm:$0xff]  }
 0x66d   :  { %v2019_v51 = vpop.eup %2018 }
 0x66e   :  { %v907_v52 = vmul.f32 %v2019_v51, %v906_v5  ;;  %v1980_v5 = vld [vmem:[%s2550_s3 + $0x24] ss:$8 sps:$4 sm:$0xff]  }
 0x670   :  { %v909_v3 = vadd.f32 %v908_v53, %v907_v52 }
 0x672   :  { %v910_v54 = vpack.c.bf16 %v909_v3, %v909_v3 }
 0x674   :  { %v912_v55 = vrot.slane %v910_v54, 4  ;;  %1046 = vmatmul.mubr.bf16.vlgmr.msra.gmra.mrb[8].mxu1 %v910_v54 }
 0x675   :  { %1362 = vmatprep.mubr.bf16.mxu1 %v2044_v0  ;;  %1331 = vmatpush1.bf16.msra.mxu1 %v1963_v26 }
 0x676   :  { %914 = vst [vmem:[#allocation3 + $0x8] sm:$0xf0] %v912_v55 }
 0x67d   :  { %v1551_v48 = vld [vmem:[#allocation3 + $0x8] sm:$0xff] }
 0x747   :  { %v1047_v56 = vpop.f32.mrb[8].mxu1 }
 0x748   :  { %v1049_v57 = vpop.f32.mrb[9].mxu1 }
 0x749   :  { %v1054_v58 = vadd.f32 %v1049_v57, %v2334_v9  ;;  %v1051_v59 = vpop.f32.mrb[10].mxu1 }
 0x74a   :  { %v1052_v61 = vpop.f32.mrb[11].mxu1  ;;  %v1981_v59 = vld [vmem:[%s2550_s3 + $0x30] ss:$8 sps:$4 sm:$0xff]  }
 0x74b   :  { %v1815_v60 = vmul.f32 -1.442695, %v1054_v58  ;;  %v1983_v58 = vld [vmem:[%s2550_s3 + $0x34] ss:$8 sps:$4 sm:$0xff]   ;;  %v1986_v61 = vld [vmem:[%s2550_s3 + $0x44] ss:$8 sps:$4 sm:$0xff]  }
 0x74d   :  { %2020 = vpow2.f32 %v1815_v60  ;;  %v1989_v60 = vld [vmem:[%s2550_s3 + $0x54] ss:$8 sps:$4 sm:$0xff]  }
 0x757   :  { %v2021_v2 = vpop.eup %2020 }
 0x758   :  { %v1058_v62 = vadd.f32 1.0, %v2021_v2  ;;  %v1987_v2 = vld [vmem:[%s2550_s3 + $0x50] ss:$8 sps:$4 sm:$0xff]  }
 0x75a   :  { %2022 = vrcp.f32 %v1058_v62  ;;  %v1992_v62 = vld [vmem:[%s2550_s3 + $0x64] ss:$8 sps:$4 sm:$0xff]  }
 0x764   :  { %v2023_v4 = vpop.eup %2022 }
 0x765   :  { %1061 = vrot.lane.b32.xlu0 %v2023_v4, %s2046_s27  ;;  %v1066_v16 = vsub.f32 1.0, %v2023_v4  ;;  %v1068_v22 = vmul.f32 %v2023_v4, %v909_v3  ;;  %v1990_v4 = vld [vmem:[%s2550_s3 + $0x60] ss:$8 sps:$4 sm:$0xff]  }
 0x7d7   :  { %v1062_v8 = vpop.permute.xlu0 %1061 }
 0x7d8   :  { %v1063_v14 = vmul.f32 %v1062_v8, %v1047_v56 }
 0x7da   :  { %v1064_v15 = vadd.f32 %v1063_v14, %v2332_v7  ;;  %v1968_v7 = vld [vmem:[%s2550_s3 + $0x14] ss:$8 sps:$4 sm:$0xff]  }
 0x7db   :  { %1332 = vmatprep.subr.bf16.mxu1 %v1968_v7  ;;  %v1995_v14 = vld [vmem:[%s2550_s3 + $0x74] ss:$8 sps:$4 sm:$0xff]  }
 0x7dc   :  { %2024 = vtanh.f32 %v1064_v15  ;;  %1333 = vmatpush1.bf16.msra.mxu1 %v1966_v30 }
 0x7dd   :  { %1334 = vmatprep.subr.bf16.mxu1 %v2145_v17 }
 0x7e0   :  { %1335 = vmatpush1.bf16.msra.mxu1 %v2151_v19 }
 0x7e1   :  { %1336 = vmatprep.subr.bf16.mxu1 %v2160_v21 }
 0x7e4   :  { %1337 = vmatpush1.bf16.msra.mxu1 %v2169_v23 }
 0x7e5   :  { %1338 = vmatprep.subr.bf16.mxu1 %v2178_v25 }
 0x7e6   :  { %v2025_v18 = vpop.eup %2024 }
 0x7e7   :  { %v1067_v20 = vmul.f32 %v2025_v18, %v1066_v16  ;;  %v1993_v16 = vld [vmem:[%s2550_s3 + $0x70] ss:$8 sps:$4 sm:$0xff]  }
 0x7e8   :  { %1339 = vmatpush1.bf16.msra.mxu1 %v2187_v27 }
 0x7e9   :  { %v1069_v9 = vadd.f32 %v1068_v22, %v1067_v20  ;;  %1340 = vmatprep.subr.bf16.mxu1 %v2196_v29 }
 0x7eb   :  { %v1070_v24 = vpack.c.bf16 %v1069_v9, %v1069_v9 }
 0x7ec   :  { %1341 = vmatpush1.bf16.msra.mxu1 %v2204_v31  ;;  %v1970_v31 = vld [vmem:[%s2553_s4] sm:$0xff]  }
 0x7ed   :  { %1071 = vst [vmem:[#allocation3 + $0x10] sm:$0xf] %v1070_v24  ;;  %1203 = vmatmul.mubr.bf16.vlgmr.msra.gmra.mrb[24].mxu0 %v1070_v24  ;;  %1342 = vmatprep.subr.bf16.mxu1 %v2213_v33 }
 0x7ee   :  { %1519 = vmatprep.mubr.bf16.mxu0 %v2044_v0  ;;  %1488 = vmatpush1.bf16.msra.mxu0 %v1963_v26 }
 0x7ef   :  { %1489 = vmatprep.subr.bf16.mxu0 %v1968_v7 }
 0x7f0   :  { %1343 = vmatpush1.bf16.msra.mxu1 %v2222_v35 }
 0x7f1   :  { %1344 = vmatprep.subr.bf16.mxu1 %v2230_v37 }
 0x7f2   :  { %1490 = vmatpush1.bf16.msra.mxu0 %v1966_v30 }
 0x7f3   :  { %1491 = vmatprep.subr.bf16.mxu0 %v1980_v5 }
 0x7f4   :  { %1345 = vmatpush1.bf16.msra.mxu1 %v2241_v39 }
 0x7f5   :  { %1887 = vmatprep.subr.bf16.mxu1 %v1970_v31 }
 0x7f6   :  { %1492 = vmatpush1.bf16.msra.mxu0 %v1978_v50 }
 0x7f7   :  { %1493 = vmatprep.subr.bf16.mxu0 %v1983_v58 }
 0x7fa   :  { %1494 = vmatpush1.bf16.msra.mxu0 %v1981_v59 }
 0x7fb   :  { %1495 = vmatprep.subr.bf16.mxu0 %v1986_v61 }
 0x8c0   :  { %v1204_v0 = vpop.f32.mrb[24].mxu0 }
 0x8c1   :  { %v1206_v17 = vpop.f32.mrb[25].mxu0 }
 0x8c2   :  { %v1211_v19 = vadd.f32 %v1206_v17, %v2338_v13  ;;  %v1208_v21 = vpop.f32.mrb[26].mxu0 }
 0x8c3   :  { %v1209_v23 = vpop.f32.mrb[27].mxu0 }
 0x8c4   :  { %v1832_v25 = vmul.f32 -1.442695, %v1211_v19 }
 0x8c6   :  { %2026 = vpow2.f32 %v1832_v25 }
 0x8d0   :  { %v2027_v27 = vpop.eup %2026 }
 0x8d1   :  { %v1215_v29 = vadd.f32 1.0, %v2027_v27 }
 0x8d3   :  { %2028 = vrcp.f32 %v1215_v29 }
 0x8dd   :  { %v2029_v33 = vpop.eup %2028 }
 0x8de   :  { %1218 = vrot.lane.b32.xlu1 %v2029_v33, %s2046_s27  ;;  %v1223_v13 = vsub.f32 1.0, %v2029_v33  ;;  %v1225_v1 = vmul.f32 %v2029_v33, %v1069_v9 }
 0x950   :  { %v1219_v35 = vpop.permute.xlu1 %1218 }
 0x951   :  { %v1220_v37 = vmul.f32 %v1219_v35, %v1204_v0 }
 0x953   :  { %v1221_v39 = vadd.f32 %v1220_v37, %v2336_v10  ;;  %v1972_v10 = vld [vmem:[%s2553_s4 + $0x10] sm:$0xff]  }
 0x955   :  { %2030 = vtanh.f32 %v1221_v39 }
 0x95f   :  { %v2031_v32 = vpop.eup %2030 }
 0x960   :  { %v1224_v34 = vmul.f32 %v2031_v32, %v1223_v13 }
 0x962   :  { %v2454_v36 = vadd.f32 %v1225_v1, %v1224_v34 }
 0x964   :  { %v1227_v6 = vpack.c.bf16 %v2454_v36, %v2454_v36 }
 0x966   :  { %v1229_v12 = vrot.slane %v1227_v6, 4  ;;  %1363 = vmatmul.mubr.bf16.vlgmr.msra.gmra.mrb[12].mxu1 %v1227_v6 }
 0x967   :  { %1888 = vmatpush3.bf16.msra.mxu1 %v1970_v31  ;;  %1903 = vmatprep.mubr.bf16.mxu1 %v1550_v63 }
 0x968   :  { %1231 = vst [vmem:[#allocation3 + $0x10] sm:$0xf0] %v1229_v12  ;;  %1889 = vmatprep.subr.bf16.mxu1 %v1971_v11 }
 0x96b   :  { %1890 = vmatpush3.bf16.msra.mxu1 %v1971_v11 }
 0x96c   :  { %1891 = vmatprep.subr.bf16.mxu1 %v1972_v10 }
 0x96f   :  { %1892 = vmatpush3.bf16.msra.mxu1 %v1972_v10  ;;  %v1552_v49 = vld [vmem:[#allocation3 + $0x10] sm:$0xff] }
 0x970   :  { %1893 = vmatprep.subr.bf16.mxu1 %v1973_v43 }
 0x973   :  { %1894 = vmatpush3.bf16.msra.mxu1 %v1973_v43 }
 0x974   :  { %1895 = vmatprep.subr.bf16.mxu1 %v1974_v44 }
 0x977   :  { %1896 = vmatpush3.bf16.msra.mxu1 %v1974_v44 }
 0x978   :  { %1897 = vmatprep.subr.bf16.mxu1 %v1975_v45 }
 0x97b   :  { %1898 = vmatpush3.bf16.msra.mxu1 %v1975_v45 }
 0x97c   :  { %1899 = vmatprep.subr.bf16.mxu1 %v1976_v46 }
 0x97f   :  { %1900 = vmatpush3.bf16.msra.mxu1 %v1976_v46 }
 0x980   :  { %1901 = vmatprep.subr.bf16.mxu1 %v1977_v47 }
 0x983   :  { %1902 = vmatpush3.bf16.msra.mxu1 %v1977_v47 }
 0x986   :  { %1904 = vmatmul.mubr.bf16.vlgmr.msra.gmra.mrb[16].mxu1 %v1551_v48 }
 0x987   :  { %1907 = vmatprep.mubr.bf16.mxu1 %v1552_v49 }
 0xa39   :  { %v1364_v51 = vpop.f32.mrb[12].mxu1 }
 0xa3a   :  { %v1366_v52 = vpop.f32.mrb[13].mxu1 }
 0xa3b   :  { %v1371_v53 = vadd.f32 %v1366_v52, %v2372_v40  ;;  %v1368_v3 = vpop.f32.mrb[14].mxu1  ;;  %v1984_v40 = vld [vmem:[%s2550_s3 + $0x40] ss:$8 sps:$4 sm:$0xff]  }
 0xa3c   :  { %v1369_v54 = vpop.f32.mrb[15].mxu1  ;;  %1496 = vmatpush1.bf16.msra.mxu0 %v1984_v40 }
 0xa3d   :  { %v1849_v55 = vmul.f32 -1.442695, %v1371_v53  ;;  %1497 = vmatprep.subr.bf16.mxu0 %v1989_v60 }
 0xa3f   :  { %2032 = vpow2.f32 %v1849_v55 }
 0xa40   :  { %1498 = vmatpush1.bf16.msra.mxu0 %v1987_v2 }
 0xa41   :  { %1499 = vmatprep.subr.bf16.mxu0 %v1992_v62 }
 0xa44   :  { %1500 = vmatpush1.bf16.msra.mxu0 %v1990_v4 }
 0xa45   :  { %1501 = vmatprep.subr.bf16.mxu0 %v1995_v14 }
 0xa48   :  { %1502 = vmatpush1.bf16.msra.mxu0 %v1993_v16 }
 0xa49   :  { %v2033_v56 = vpop.eup %2032 }
 0xa4a   :  { %v1375_v57 = vadd.f32 1.0, %v2033_v56 }
 0xa4c   :  { %2034 = vrcp.f32 %v1375_v57 }
 0xa56   :  { %v2035_v8 = vpop.eup %2034 }
 0xa57   :  { %1378 = vrot.lane.b32.xlu0 %v2035_v8, %s2046_s27  ;;  %v1383_v28 = vsub.f32 1.0, %v2035_v8  ;;  %v1385_v0 = vmul.f32 %v2035_v8, %v2454_v36 }
 0xa59   :  { %v1905_v15 = vpop.f32.mrb[16].mxu1 }
 0xa5a   :  { %1685 = vst [vmem:[%s2554_s5 + $0x10] sm:$0xff] %v1905_v15  ;;  %v1652_v18 = vpop.f32.mrb[17].mxu1 }
 0xa5b   :  { %1683 = vst [vmem:[%s2554_s5] sm:$0xff] %v1652_v18  ;;  %v1906_v20 = vpop.f32.mrb[18].mxu1 }
 0xa5c   :  { %1686 = vst [vmem:[%s2554_s5 + $0x18] sm:$0xff] %v1906_v20  ;;  %v1655_v22 = vpop.f32.mrb[19].mxu1 }
 0xa5d   :  { %1684 = vst [vmem:[%s2554_s5 + $0x8] sm:$0xff] %v1655_v22 }
 0xac9   :  { %v1379_v9 = vpop.permute.xlu0 %1378 }
 0xaca   :  { %v1380_v24 = vmul.f32 %v1379_v9, %v1364_v51 }
 0xacc   :  { %v1381_v26 = vadd.f32 %v1380_v24, %v2370_v38 }
 0xace   :  { %2036 = vtanh.f32 %v1381_v26 }
 0xad8   :  { %v2037_v7 = vpop.eup %2036 }
 0xad9   :  { %v1384_v30 = vmul.f32 %v2037_v7, %v1383_v28 }
 0xadb   :  { %v1386_v17 = vadd.f32 %v1385_v0, %v1384_v30 }
 0xadd   :  { %v1387_v19 = vpack.c.bf16 %v1386_v17, %v1386_v17 }
 0xadf   :  { %1388 = vst [vmem:[#allocation3 + $0x18] sm:$0xf] %v1387_v19  ;;  %1520 = vmatmul.mubr.bf16.vlgmr.msra.gmra.mrb[28].mxu0 %v1387_v19 }
 0xbb2   :  { %v1521_v21 = vpop.f32.mrb[28].mxu0 }
 0xbb3   :  { %v1523_v23 = vpop.f32.mrb[29].mxu0 }
 0xbb4   :  { %v1528_v25 = vadd.f32 %v1523_v23, %v2376_v42  ;;  %v1525_v27 = vpop.f32.mrb[30].mxu0 }
 0xbb5   :  { %v1526_v29 = vpop.f32.mrb[31].mxu0 }
 0xbb6   :  { %v1866_v31 = vmul.f32 -1.442695, %v1528_v25 }
 0xbb8   :  { %2038 = vpow2.f32 %v1866_v31 }
 0xbc2   :  { %v2039_v33 = vpop.eup %2038 }
 0xbc3   :  { %v1532_v38 = vadd.f32 1.0, %v2039_v33 }
 0xbc5   :  { %2040 = vrcp.f32 %v1532_v38 }
 0xbcf   :  { %v2041_v35 = vpop.eup %2040 }
 0xbd0   :  { %1535 = vrot.lane.b32.xlu1 %v2041_v35, %s2046_s27  ;;  %v1540_v32 = vsub.f32 1.0, %v2041_v35  ;;  %v1542_v36 = vmul.f32 %v2041_v35, %v1386_v17 }
 0xc42   :  { %v1536_v37 = vpop.permute.xlu1 %1535 }
 0xc43   :  { %v1537_v39 = vmul.f32 %v1536_v37, %v1521_v21 }
 0xc45   :  { %v1538_v13 = vadd.f32 %v1537_v39, %v2374_v41 }
 0xc47   :  { %2042 = vtanh.f32 %v1538_v13 }
 0xc51   :  { %v2043_v34 = vpop.eup %2042 }
 0xc52   :  { %v1541_v1 = vmul.f32 %v2043_v34, %v1540_v32 }
 0xc54   :  { %v1543_v42 = vadd.f32 %v1542_v36, %v1541_v1 }
 0xc56   :  { %v1544_v6 = vpack.c.bf16 %v1543_v42, %v1543_v42  ;;  %1549 = vst [vmem:[%s2555_s6] sm:$0xff] %v1543_v42 }
 0xc58   :  { %v1546_v11 = vrot.slane %v1544_v6, 4 }
 0xc5a   :  { %1548 = vst [vmem:[#allocation3 + $0x18] sm:$0xf0] %v1546_v11 }
 0xc61   :  { %v1553_v12 = vld [vmem:[#allocation3 + $0x18] sm:$0xff] }
 0xc62   :  { %1908 = vmatmul.mubr.bf16.gmra.mrb[20].mxu1 %v1553_v12 }
 0xd35   :  { %v1909_v63 = vpop.f32.mrb[20].mxu1 }
 0xd36   :  { %1689 = vst [vmem:[%s2554_s5 + $0x30] sm:$0xff] %v1909_v63  ;;  %v1668_v41 = vpop.f32.mrb[21].mxu1 }
 0xd37   :  { %1687 = vst [vmem:[%s2554_s5 + $0x20] sm:$0xff] %v1668_v41  ;;  %v1910_v10 = vpop.f32.mrb[22].mxu1 }
 0xd38   :  { %1690 = vst [vmem:[%s2554_s5 + $0x38] sm:$0xff] %v1910_v10  ;;  %v1671_v43 = vpop.f32.mrb[23].mxu1 }
 0xd39   :  { %1688 = vst [vmem:[%s2554_s5 + $0x28] sm:$0xff] %v1671_v43 }

</bundles_post_ra>
